<compile_context>
chip_gen: v6e
topology: v6e:2x2x1
jax: 0.10.0
libtpu: 0.0.40
codegen_flags: <defaults>
</compile_context>

<pallas_src>
import jax
import jax.numpy as jnp
from jax.experimental import pallas as pl
from jax.experimental.pallas import tpu as pltpu

# ---------------- model hyper-parameters (small, consistent with the module) ----
B = 2            # batch
S = 8            # sequence length
D = 32           # d_model
H = 4            # number of attention heads
HD = D // H      # head dim
F = 64           # dim_feedforward (scaled down from 2048)
LN_EPS = 1e-5
BS = B * S

# packed-weight lane offsets: [ wqkv (3D) | wo (D) | w1 (F) ]  -> (D, 3D+D+F)
_W_QKV_LO, _W_QKV_HI = 0, 3 * D
_W_O_LO, _W_O_HI = 3 * D, 4 * D
_W_1_LO, _W_1_HI = 4 * D, 4 * D + F
_WPK_COLS = 4 * D + F            # 192

# packed-vector rows (one (8,128) f32 array): row -> vector
_VR_BQKV, _VR_BO, _VR_G1, _VR_BE1, _VR_B1, _VR_B2, _VR_G2, _VR_BE2 = range(8)


def encoder_layer_kernel(
    x_ref,        # (B*S, D)
    wpk_ref,      # (D, 192)  = [ wqkv(scale folded into q) | wo | w1 ]
    w2_ref,       # (F, D)
    vec_ref,      # (8, 128)  packed biases / LN params
    o_ref,        # (B*S, D)
    ctx_sc,       # VMEM scratch (B*S, D) — per-head context assembly
):
    x = x_ref[...]                                        # (16, 32)
    wpk = wpk_ref[...]                                    # (32, 192)
    vec = vec_ref[...]                                    # (8, 128)

    # static row slices of the packed vector array (free, no extra DMAs)
    bqkv = vec[_VR_BQKV:_VR_BQKV + 1, 0:3 * D]            # (1, 96), q-part pre-scaled
    bo   = vec[_VR_BO:_VR_BO + 1, 0:D]
    g1   = vec[_VR_G1:_VR_G1 + 1, 0:D]
    be1  = vec[_VR_BE1:_VR_BE1 + 1, 0:D]
    b1   = vec[_VR_B1:_VR_B1 + 1, 0:F]
    b2   = vec[_VR_B2:_VR_B2 + 1, 0:D]
    g2   = vec[_VR_G2:_VR_G2 + 1, 0:D]
    be2  = vec[_VR_BE2:_VR_BE2 + 1, 0:D]

    # ---- fused QKV projection: one MXU op; 1/sqrt(HD) already folded into Wq/bq
    qkv = jnp.dot(x, wpk[:, _W_QKV_LO:_W_QKV_HI],
                  preferred_element_type=jnp.float32) + bqkv      # (16, 96)
    q = qkv[:, 0 * D:1 * D]
    k = qkv[:, 1 * D:2 * D]
    v = qkv[:, 2 * D:3 * D]

    # ---- multi-head attention, batched over B inside each head ---------------
    # Short static loop over H with B-batched 3-D einsums; per-head context is
    # stored into a VMEM scratch slice (no lane-concat masked selects).
    for h in range(H):
        lo = h * HD
        qh = q[:, lo:lo + HD].reshape(B, S, HD)           # (2, 8, 8)
        kh = k[:, lo:lo + HD].reshape(B, S, HD)
        vh = v[:, lo:lo + HD].reshape(B, S, HD)
        s = jnp.einsum('bqd,bkd->bqk', qh, kh,
                       preferred_element_type=jnp.float32)        # (2, 8, 8)
        m = jnp.max(s, axis=-1, keepdims=True)
        e = jnp.exp(s - m)
        # exact reciprocal: stays comfortably inside the 1e-4 tolerance
        p = e * pl.reciprocal(jnp.sum(e, axis=-1, keepdims=True), approx=False)
        ctx_h = jnp.einsum('bqk,bkd->bqd', p, vh,
                           preferred_element_type=jnp.float32)    # (2, 8, 8)
        ctx_sc[:, lo:lo + HD] = ctx_h.reshape(BS, HD)

    ctx = ctx_sc[...]                                     # (16, 32)

    # ---- single output projection for all heads / both batches ---------------
    sa = jnp.dot(ctx, wpk[:, _W_O_LO:_W_O_HI],
                 preferred_element_type=jnp.float32) + bo
    # dropout1 is identity in eval mode

    # ---- residual + LayerNorm1 (post-norm) ------------------------------------
    x1 = x + sa
    mu1 = jnp.mean(x1, axis=-1, keepdims=True)
    var1 = jnp.mean((x1 - mu1) ** 2, axis=-1, keepdims=True)
    y = (x1 - mu1) * jax.lax.rsqrt(var1 + LN_EPS) * g1 + be1

    # ---- feed-forward block on all 16 rows at once ----------------------------
    h1 = jnp.dot(y, wpk[:, _W_1_LO:_W_1_HI],
                 preferred_element_type=jnp.float32) + b1
    h1 = jnp.maximum(h1, 0.0)                 # ReLU; inner dropout identity
    ff = jnp.dot(h1, w2_ref[...], preferred_element_type=jnp.float32) + b2
    # dropout2 identity

    # ---- residual + LayerNorm2 -------------------------------------------------
    x2 = y + ff
    mu2 = jnp.mean(x2, axis=-1, keepdims=True)
    var2 = jnp.mean((x2 - mu2) ** 2, axis=-1, keepdims=True)
    out = (x2 - mu2) * jax.lax.rsqrt(var2 + LN_EPS) * g2 + be2

    o_ref[...] = out.astype(o_ref.dtype)


def pack_params(p):
    """One-time packing of all parameters into 3 arrays (call once, not per step)."""
    scale = 1.0 / jnp.sqrt(jnp.float32(HD))
    # fold the softmax scale into Wq / bq columns of the fused QKV block
    wqkv = jnp.concatenate([p["wq"] * scale, p["wk"], p["wv"]], axis=1)   # (D, 3D)
    wpk = jnp.concatenate([wqkv, p["wo"], p["w1"]], axis=1)               # (D, 192)
    assert wpk.shape == (D, _WPK_COLS)

    vec = jnp.zeros((8, 128), jnp.float32)
    vec = vec.at[_VR_BQKV, 0:3 * D].set(
        jnp.concatenate([p["bq"][0] * scale, p["bk"][0], p["bv"][0]]))
    vec = vec.at[_VR_BO, 0:D].set(p["bo"][0])
    vec = vec.at[_VR_G1, 0:D].set(p["g1"][0])
    vec = vec.at[_VR_BE1, 0:D].set(p["be1"][0])
    vec = vec.at[_VR_B1, 0:F].set(p["b1"][0])
    vec = vec.at[_VR_B2, 0:D].set(p["b2"][0])
    vec = vec.at[_VR_G2, 0:D].set(p["g2"][0])
    vec = vec.at[_VR_BE2, 0:D].set(p["be2"][0])

    return {"wpk": wpk, "w2": p["w2"], "vec": vec}


def transformer_encoder_layer(x, packed):
    """x: (B, S, D) float32. packed: output of pack_params (precomputed once)."""
    x2d = x.reshape(BS, D)
    # No grid: one program, 4 input DMAs (x + packed weights + w2 + packed
    # vectors); everything lives whole-array in VMEM (~50 KB).
    out2d = pl.pallas_call(
        encoder_layer_kernel,
        out_shape=jax.ShapeDtypeStruct((BS, D), jnp.float32),
        scratch_shapes=[pltpu.VMEM((BS, D), jnp.float32)],
    )(x2d, packed["wpk"], packed["w2"], packed["vec"])
    return out2d.reshape(B, S, D)


def reference(x, p):
    """Pure-JAX reference (unpacked params) for correctness checking."""
    def attn(xb):
        q = xb @ p["wq"] + p["bq"][0]
        k = xb @ p["wk"] + p["bk"][0]
        v = xb @ p["wv"] + p["bv"][0]
        out = jnp.zeros((S, D), jnp.float32)
        for h in range(H):
            lo, hi = h * HD, (h + 1) * HD
            s = (q[:, lo:hi] @ k[:, lo:hi].T) / jnp.sqrt(jnp.float32(HD))
            pmat = jax.nn.softmax(s, axis=-1)
            out = out + (pmat @ v[:, lo:hi]) @ p["wo"][lo:hi, :]
        return out + p["bo"][0]

    def ln(z, g, b):
        mu = jnp.mean(z, axis=-1, keepdims=True)
        var = jnp.mean((z - mu) ** 2, axis=-1, keepdims=True)
        return (z - mu) * jax.lax.rsqrt(var + LN_EPS) * g[0] + b[0]

    outs = []
    for b in range(B):
        xb = x[b]
        y = ln(xb + attn(xb), p["g1"], p["be1"])
        ff = jnp.maximum(y @ p["w1"] + p["b1"][0], 0.0) @ p["w2"] + p["b2"][0]
        outs.append(ln(y + ff, p["g2"], p["be2"]))
    return jnp.stack(outs)


if __name__ == "__main__":
    key = jax.random.PRNGKey(0)
    ks = jax.random.split(key, 12)

    def init(k, shape, fan_in):
        return (jax.random.normal(k, shape, jnp.float32) / jnp.sqrt(jnp.float32(fan_in)))

    params = {
        "wq": init(ks[0], (D, D), D), "wk": init(ks[1], (D, D), D),
        "wv": init(ks[2], (D, D), D), "wo": init(ks[3], (D, D), D),
        "bq": jnp.zeros((1, D), jnp.float32),
        "bk": jnp.zeros((1, D), jnp.float32),
        "bv": jnp.zeros((1, D), jnp.float32),
        "bo": 0.01 * jnp.ones((1, D), jnp.float32),
        "w1": init(ks[4], (D, F), D), "b1": 0.01 * jnp.ones((1, F), jnp.float32),
        "w2": init(ks[5], (F, D), F), "b2": 0.01 * jnp.ones((1, D), jnp.float32),
        "g1": jnp.ones((1, D), jnp.float32), "be1": jnp.zeros((1, D), jnp.float32),
        "g2": jnp.ones((1, D), jnp.float32), "be2": jnp.zeros((1, D), jnp.float32),
    }

    # Pack once (out of the per-call path).
    packed = pack_params(params)
    packed = jax.tree_util.tree_map(jax.block_until_ready, packed)

    x = jax.random.normal(ks[6], (B, S, D), jnp.float32)

    out = transformer_encoder_layer(x, packed)
    out = jax.block_until_ready(out)

    ref = reference(x, params)
    assert out.shape == (B, S, D)
    assert jnp.allclose(out, ref, atol=1e-4, rtol=1e-4), "mismatch vs reference"

    print("KERNEL_OK")
</pallas_src>

<mosaic_0001>
module attributes {stable_mosaic.version = 11 : i64} {
  func.func @encoder_layer_kernel(%arg0: memref<16x32xf32, #tpu.memory_space<vmem>>, %arg1: memref<32x192xf32, #tpu.memory_space<vmem>>, %arg2: memref<64x32xf32, #tpu.memory_space<vmem>>, %arg3: memref<8x128xf32, #tpu.memory_space<vmem>>, %arg4: memref<16x32xf32, #tpu.memory_space<vmem>>, %arg5: memref<16x32xf32, #tpu.memory_space<vmem>>) attributes {dimension_semantics = [], scalar_prefetch = 0 : i64, scratch_operands = 1 : i64, tpu.core_type = #tpu.core_type<tc>} {
    %c0 = arith.constant 0 : index
    %c0_0 = arith.constant 0 : index
    %0 = vector.load %arg0[%c0, %c0_0] : memref<16x32xf32, #tpu.memory_space<vmem>>, vector<16x32xf32>
    %c0_1 = arith.constant 0 : index
    %c0_2 = arith.constant 0 : index
    %1 = vector.load %arg1[%c0_1, %c0_2] : memref<32x192xf32, #tpu.memory_space<vmem>>, vector<32x192xf32>
    %c0_3 = arith.constant 0 : index
    %c0_4 = arith.constant 0 : index
    %2 = vector.load %arg3[%c0_3, %c0_4] : memref<8x128xf32, #tpu.memory_space<vmem>>, vector<8x128xf32>
    %3 = vector.extract_strided_slice %2 {offsets = [0, 0], sizes = [1, 96], strides = [1, 1]} : vector<8x128xf32> to vector<1x96xf32>
    %4 = vector.extract_strided_slice %2 {offsets = [1, 0], sizes = [1, 32], strides = [1, 1]} : vector<8x128xf32> to vector<1x32xf32>
    %5 = vector.extract_strided_slice %2 {offsets = [2, 0], sizes = [1, 32], strides = [1, 1]} : vector<8x128xf32> to vector<1x32xf32>
    %6 = vector.extract_strided_slice %2 {offsets = [3, 0], sizes = [1, 32], strides = [1, 1]} : vector<8x128xf32> to vector<1x32xf32>
    %7 = vector.extract_strided_slice %2 {offsets = [4, 0], sizes = [1, 64], strides = [1, 1]} : vector<8x128xf32> to vector<1x64xf32>
    %8 = vector.extract_strided_slice %2 {offsets = [5, 0], sizes = [1, 32], strides = [1, 1]} : vector<8x128xf32> to vector<1x32xf32>
    %9 = vector.extract_strided_slice %2 {offsets = [6, 0], sizes = [1, 32], strides = [1, 1]} : vector<8x128xf32> to vector<1x32xf32>
    %10 = vector.extract_strided_slice %2 {offsets = [7, 0], sizes = [1, 32], strides = [1, 1]} : vector<8x128xf32> to vector<1x32xf32>
    %11 = vector.extract_strided_slice %1 {offsets = [0, 0], sizes = [32, 96], strides = [1, 1]} : vector<32x192xf32> to vector<32x96xf32>
    %cst = arith.constant dense<0.000000e+00> : vector<16x96xf32>
    %12 = tpu.matmul %0, %11, %cst {dimension_numbers = #tpu.dot_dimension_numbers<[1], [0], [0], [1], [0, 0, 1, 1], [], []>} : vector<16x32xf32>, vector<32x96xf32>, vector<16x96xf32> -> vector<16x96xf32>
    %13 = vector.broadcast %3 : vector<1x96xf32> to vector<16x96xf32>
    %14 = arith.addf %12, %13 : vector<16x96xf32>
    %15 = vector.extract_strided_slice %14 {offsets = [0, 0], sizes = [16, 32], strides = [1, 1]} : vector<16x96xf32> to vector<16x32xf32>
    %16 = vector.extract_strided_slice %14 {offsets = [0, 32], sizes = [16, 32], strides = [1, 1]} : vector<16x96xf32> to vector<16x32xf32>
    %17 = vector.extract_strided_slice %14 {offsets = [0, 64], sizes = [16, 32], strides = [1, 1]} : vector<16x96xf32> to vector<16x32xf32>
    %18 = vector.extract_strided_slice %15 {offsets = [0, 0], sizes = [16, 8], strides = [1, 1]} : vector<16x32xf32> to vector<16x8xf32>
    %19 = vector.shape_cast %18 : vector<16x8xf32> to vector<2x8x8xf32>
    %20 = vector.extract_strided_slice %16 {offsets = [0, 0], sizes = [16, 8], strides = [1, 1]} : vector<16x32xf32> to vector<16x8xf32>
    %21 = vector.shape_cast %20 : vector<16x8xf32> to vector<2x8x8xf32>
    %22 = vector.extract_strided_slice %17 {offsets = [0, 0], sizes = [16, 8], strides = [1, 1]} : vector<16x32xf32> to vector<16x8xf32>
    %23 = vector.shape_cast %22 : vector<16x8xf32> to vector<2x8x8xf32>
    "tpu.trace_start"() <{level = 10 : i32, message = "bqd,bkd->bqk"}> : () -> ()
    %cst_5 = arith.constant dense<0.000000e+00> : vector<2x8x8xf32>
    %24 = tpu.matmul %19, %21, %cst_5 {dimension_numbers = #tpu.dot_dimension_numbers<[2], [2], [1], [1], [0, 0, 0, 1, 1, 1], [0], [0]>} : vector<2x8x8xf32>, vector<2x8x8xf32>, vector<2x8x8xf32> -> vector<2x8x8xf32>
    "tpu.trace_stop"() : () -> ()
    %cst_6 = arith.constant dense<0xFF800000> : vector<2x8xf32>
    %25 = vector.multi_reduction <maximumf>, %24, %cst_6 [2] : vector<2x8x8xf32> to vector<2x8xf32>
    %26 = vector.shape_cast %25 : vector<2x8xf32> to vector<2x8x1xf32>
    %27 = vector.broadcast %26 : vector<2x8x1xf32> to vector<2x8x8xf32>
    %28 = arith.subf %24, %27 : vector<2x8x8xf32>
    %29 = math.exp %28 : vector<2x8x8xf32>
    %cst_7 = arith.constant dense<0.000000e+00> : vector<2x8xf32>
    %30 = vector.multi_reduction <add>, %29, %cst_7 [2] : vector<2x8x8xf32> to vector<2x8xf32>
    %31 = vector.shape_cast %30 : vector<2x8xf32> to vector<2x8x1xf32>
    %32 = tpu.reciprocal %31 : vector<2x8x1xf32> -> vector<2x8x1xf32>
    %33 = vector.broadcast %32 : vector<2x8x1xf32> to vector<2x8x8xf32>
    %34 = arith.mulf %29, %33 : vector<2x8x8xf32>
    "tpu.trace_start"() <{level = 10 : i32, message = "bqk,bkd->bqd"}> : () -> ()
    %cst_8 = arith.constant dense<0.000000e+00> : vector<2x8x8xf32>
    %35 = tpu.matmul %34, %23, %cst_8 {dimension_numbers = #tpu.dot_dimension_numbers<[2], [1], [1], [2], [0, 0, 0, 1, 1, 2], [0], [0]>} : vector<2x8x8xf32>, vector<2x8x8xf32>, vector<2x8x8xf32> -> vector<2x8x8xf32>
    "tpu.trace_stop"() : () -> ()
    %36 = vector.shape_cast %35 : vector<2x8x8xf32> to vector<16x8xf32>
    %c0_9 = arith.constant 0 : index
    %c0_10 = arith.constant 0 : index
    %37 = vector.load %arg5[%c0_9, %c0_10] : memref<16x32xf32, #tpu.memory_space<vmem>>, vector<16x8xf32>
    tpu.vector_store %arg5[%c0_9, %c0_10], %36 {strides = array<i32>} : memref<16x32xf32, #tpu.memory_space<vmem>>, vector<16x8xf32>,
    %38 = vector.extract_strided_slice %15 {offsets = [0, 8], sizes = [16, 8], strides = [1, 1]} : vector<16x32xf32> to vector<16x8xf32>
    %39 = vector.shape_cast %38 : vector<16x8xf32> to vector<2x8x8xf32>
    %40 = vector.extract_strided_slice %16 {offsets = [0, 8], sizes = [16, 8], strides = [1, 1]} : vector<16x32xf32> to vector<16x8xf32>
    %41 = vector.shape_cast %40 : vector<16x8xf32> to vector<2x8x8xf32>
    %42 = vector.extract_strided_slice %17 {offsets = [0, 8], sizes = [16, 8], strides = [1, 1]} : vector<16x32xf32> to vector<16x8xf32>
    %43 = vector.shape_cast %42 : vector<16x8xf32> to vector<2x8x8xf32>
    "tpu.trace_start"() <{level = 10 : i32, message = "bqd,bkd->bqk"}> : () -> ()
    %cst_11 = arith.constant dense<0.000000e+00> : vector<2x8x8xf32>
    %44 = tpu.matmul %39, %41, %cst_11 {dimension_numbers = #tpu.dot_dimension_numbers<[2], [2], [1], [1], [0, 0, 0, 1, 1, 1], [0], [0]>} : vector<2x8x8xf32>, vector<2x8x8xf32>, vector<2x8x8xf32> -> vector<2x8x8xf32>
    "tpu.trace_stop"() : () -> ()
    %cst_12 = arith.constant dense<0xFF800000> : vector<2x8xf32>
    %45 = vector.multi_reduction <maximumf>, %44, %cst_12 [2] : vector<2x8x8xf32> to vector<2x8xf32>
    %46 = vector.shape_cast %45 : vector<2x8xf32> to vector<2x8x1xf32>
    %47 = vector.broadcast %46 : vector<2x8x1xf32> to vector<2x8x8xf32>
    %48 = arith.subf %44, %47 : vector<2x8x8xf32>
    %49 = math.exp %48 : vector<2x8x8xf32>
    %cst_13 = arith.constant dense<0.000000e+00> : vector<2x8xf32>
    %50 = vector.multi_reduction <add>, %49, %cst_13 [2] : vector<2x8x8xf32> to vector<2x8xf32>
    %51 = vector.shape_cast %50 : vector<2x8xf32> to vector<2x8x1xf32>
    %52 = tpu.reciprocal %51 : vector<2x8x1xf32> -> vector<2x8x1xf32>
    %53 = vector.broadcast %52 : vector<2x8x1xf32> to vector<2x8x8xf32>
    %54 = arith.mulf %49, %53 : vector<2x8x8xf32>
    "tpu.trace_start"() <{level = 10 : i32, message = "bqk,bkd->bqd"}> : () -> ()
    %cst_14 = arith.constant dense<0.000000e+00> : vector<2x8x8xf32>
    %55 = tpu.matmul %54, %43, %cst_14 {dimension_numbers = #tpu.dot_dimension_numbers<[2], [1], [1], [2], [0, 0, 0, 1, 1, 2], [0], [0]>} : vector<2x8x8xf32>, vector<2x8x8xf32>, vector<2x8x8xf32> -> vector<2x8x8xf32>
    "tpu.trace_stop"() : () -> ()
    %56 = vector.shape_cast %55 : vector<2x8x8xf32> to vector<16x8xf32>
    %c0_15 = arith.constant 0 : index
    %c8 = arith.constant 8 : index
    %57 = vector.load %arg5[%c0_15, %c8] : memref<16x32xf32, #tpu.memory_space<vmem>>, vector<16x8xf32>
    tpu.vector_store %arg5[%c0_15, %c8], %56 {strides = array<i32>} : memref<16x32xf32, #tpu.memory_space<vmem>>, vector<16x8xf32>,
    %58 = vector.extract_strided_slice %15 {offsets = [0, 16], sizes = [16, 8], strides = [1, 1]} : vector<16x32xf32> to vector<16x8xf32>
    %59 = vector.shape_cast %58 : vector<16x8xf32> to vector<2x8x8xf32>
    %60 = vector.extract_strided_slice %16 {offsets = [0, 16], sizes = [16, 8], strides = [1, 1]} : vector<16x32xf32> to vector<16x8xf32>
    %61 = vector.shape_cast %60 : vector<16x8xf32> to vector<2x8x8xf32>
    %62 = vector.extract_strided_slice %17 {offsets = [0, 16], sizes = [16, 8], strides = [1, 1]} : vector<16x32xf32> to vector<16x8xf32>
    %63 = vector.shape_cast %62 : vector<16x8xf32> to vector<2x8x8xf32>
    "tpu.trace_start"() <{level = 10 : i32, message = "bqd,bkd->bqk"}> : () -> ()
    %cst_16 = arith.constant dense<0.000000e+00> : vector<2x8x8xf32>
    %64 = tpu.matmul %59, %61, %cst_16 {dimension_numbers = #tpu.dot_dimension_numbers<[2], [2], [1], [1], [0, 0, 0, 1, 1, 1], [0], [0]>} : vector<2x8x8xf32>, vector<2x8x8xf32>, vector<2x8x8xf32> -> vector<2x8x8xf32>
    "tpu.trace_stop"() : () -> ()
    %cst_17 = arith.constant dense<0xFF800000> : vector<2x8xf32>
    %65 = vector.multi_reduction <maximumf>, %64, %cst_17 [2] : vector<2x8x8xf32> to vector<2x8xf32>
    %66 = vector.shape_cast %65 : vector<2x8xf32> to vector<2x8x1xf32>
    %67 = vector.broadcast %66 : vector<2x8x1xf32> to vector<2x8x8xf32>
    %68 = arith.subf %64, %67 : vector<2x8x8xf32>
    %69 = math.exp %68 : vector<2x8x8xf32>
    %cst_18 = arith.constant dense<0.000000e+00> : vector<2x8xf32>
    %70 = vector.multi_reduction <add>, %69, %cst_18 [2] : vector<2x8x8xf32> to vector<2x8xf32>
    %71 = vector.shape_cast %70 : vector<2x8xf32> to vector<2x8x1xf32>
    %72 = tpu.reciprocal %71 : vector<2x8x1xf32> -> vector<2x8x1xf32>
    %73 = vector.broadcast %72 : vector<2x8x1xf32> to vector<2x8x8xf32>
    %74 = arith.mulf %69, %73 : vector<2x8x8xf32>
    "tpu.trace_start"() <{level = 10 : i32, message = "bqk,bkd->bqd"}> : () -> ()
    %cst_19 = arith.constant dense<0.000000e+00> : vector<2x8x8xf32>
    %75 = tpu.matmul %74, %63, %cst_19 {dimension_numbers = #tpu.dot_dimension_numbers<[2], [1], [1], [2], [0, 0, 0, 1, 1, 2], [0], [0]>} : vector<2x8x8xf32>, vector<2x8x8xf32>, vector<2x8x8xf32> -> vector<2x8x8xf32>
    "tpu.trace_stop"() : () -> ()
    %76 = vector.shape_cast %75 : vector<2x8x8xf32> to vector<16x8xf32>
    %c0_20 = arith.constant 0 : index
    %c16 = arith.constant 16 : index
    %77 = vector.load %arg5[%c0_20, %c16] : memref<16x32xf32, #tpu.memory_space<vmem>>, vector<16x8xf32>
    tpu.vector_store %arg5[%c0_20, %c16], %76 {strides = array<i32>} : memref<16x32xf32, #tpu.memory_space<vmem>>, vector<16x8xf32>,
    %78 = vector.extract_strided_slice %15 {offsets = [0, 24], sizes = [16, 8], strides = [1, 1]} : vector<16x32xf32> to vector<16x8xf32>
    %79 = vector.shape_cast %78 : vector<16x8xf32> to vector<2x8x8xf32>
    %80 = vector.extract_strided_slice %16 {offsets = [0, 24], sizes = [16, 8], strides = [1, 1]} : vector<16x32xf32> to vector<16x8xf32>
    %81 = vector.shape_cast %80 : vector<16x8xf32> to vector<2x8x8xf32>
    %82 = vector.extract_strided_slice %17 {offsets = [0, 24], sizes = [16, 8], strides = [1, 1]} : vector<16x32xf32> to vector<16x8xf32>
    %83 = vector.shape_cast %82 : vector<16x8xf32> to vector<2x8x8xf32>
    "tpu.trace_start"() <{level = 10 : i32, message = "bqd,bkd->bqk"}> : () -> ()
    %cst_21 = arith.constant dense<0.000000e+00> : vector<2x8x8xf32>
    %84 = tpu.matmul %79, %81, %cst_21 {dimension_numbers = #tpu.dot_dimension_numbers<[2], [2], [1], [1], [0, 0, 0, 1, 1, 1], [0], [0]>} : vector<2x8x8xf32>, vector<2x8x8xf32>, vector<2x8x8xf32> -> vector<2x8x8xf32>
    "tpu.trace_stop"() : () -> ()
    %cst_22 = arith.constant dense<0xFF800000> : vector<2x8xf32>
    %85 = vector.multi_reduction <maximumf>, %84, %cst_22 [2] : vector<2x8x8xf32> to vector<2x8xf32>
    %86 = vector.shape_cast %85 : vector<2x8xf32> to vector<2x8x1xf32>
    %87 = vector.broadcast %86 : vector<2x8x1xf32> to vector<2x8x8xf32>
    %88 = arith.subf %84, %87 : vector<2x8x8xf32>
    %89 = math.exp %88 : vector<2x8x8xf32>
    %cst_23 = arith.constant dense<0.000000e+00> : vector<2x8xf32>
    %90 = vector.multi_reduction <add>, %89, %cst_23 [2] : vector<2x8x8xf32> to vector<2x8xf32>
    %91 = vector.shape_cast %90 : vector<2x8xf32> to vector<2x8x1xf32>
    %92 = tpu.reciprocal %91 : vector<2x8x1xf32> -> vector<2x8x1xf32>
    %93 = vector.broadcast %92 : vector<2x8x1xf32> to vector<2x8x8xf32>
    %94 = arith.mulf %89, %93 : vector<2x8x8xf32>
    "tpu.trace_start"() <{level = 10 : i32, message = "bqk,bkd->bqd"}> : () -> ()
    %cst_24 = arith.constant dense<0.000000e+00> : vector<2x8x8xf32>
    %95 = tpu.matmul %94, %83, %cst_24 {dimension_numbers = #tpu.dot_dimension_numbers<[2], [1], [1], [2], [0, 0, 0, 1, 1, 2], [0], [0]>} : vector<2x8x8xf32>, vector<2x8x8xf32>, vector<2x8x8xf32> -> vector<2x8x8xf32>
    "tpu.trace_stop"() : () -> ()
    %96 = vector.shape_cast %95 : vector<2x8x8xf32> to vector<16x8xf32>
    %c0_25 = arith.constant 0 : index
    %c24 = arith.constant 24 : index
    %97 = vector.load %arg5[%c0_25, %c24] : memref<16x32xf32, #tpu.memory_space<vmem>>, vector<16x8xf32>
    tpu.vector_store %arg5[%c0_25, %c24], %96 {strides = array<i32>} : memref<16x32xf32, #tpu.memory_space<vmem>>, vector<16x8xf32>,
    %c0_26 = arith.constant 0 : index
    %c0_27 = arith.constant 0 : index
    %98 = vector.load %arg5[%c0_26, %c0_27] : memref<16x32xf32, #tpu.memory_space<vmem>>, vector<16x32xf32>
    %99 = vector.extract_strided_slice %1 {offsets = [0, 96], sizes = [32, 32], strides = [1, 1]} : vector<32x192xf32> to vector<32x32xf32>
    %cst_28 = arith.constant dense<0.000000e+00> : vector<16x32xf32>
    %100 = tpu.matmul %98, %99, %cst_28 {dimension_numbers = #tpu.dot_dimension_numbers<[1], [0], [0], [1], [0, 0, 1, 1], [], []>} : vector<16x32xf32>, vector<32x32xf32>, vector<16x32xf32> -> vector<16x32xf32>
    %101 = vector.broadcast %4 : vector<1x32xf32> to vector<16x32xf32>
    %102 = arith.addf %100, %101 : vector<16x32xf32>
    %103 = arith.addf %0, %102 : vector<16x32xf32>
    %cst_29 = arith.constant dense<0.000000e+00> : vector<16xf32>
    %104 = vector.multi_reduction <add>, %103, %cst_29 [1] : vector<16x32xf32> to vector<16xf32>
    %105 = vector.shape_cast %104 : vector<16xf32> to vector<16x1xf32>
    %cst_30 = arith.constant 3.200000e+01 : f32
    %106 = vector.broadcast %cst_30 : f32 to vector<16x1xf32>
    %107 = arith.divf %105, %106 : vector<16x1xf32>
    %108 = vector.broadcast %107 : vector<16x1xf32> to vector<16x32xf32>
    %109 = arith.subf %103, %108 : vector<16x32xf32>
    %110 = arith.mulf %109, %109 : vector<16x32xf32>
    %cst_31 = arith.constant dense<0.000000e+00> : vector<16xf32>
    %111 = vector.multi_reduction <add>, %110, %cst_31 [1] : vector<16x32xf32> to vector<16xf32>
    %112 = vector.shape_cast %111 : vector<16xf32> to vector<16x1xf32>
    %cst_32 = arith.constant 3.200000e+01 : f32
    %113 = vector.broadcast %cst_32 : f32 to vector<16x1xf32>
    %114 = arith.divf %112, %113 : vector<16x1xf32>
    %115 = vector.broadcast %107 : vector<16x1xf32> to vector<16x32xf32>
    %116 = arith.subf %103, %115 : vector<16x32xf32>
    %cst_33 = arith.constant 9.99999974E-6 : f32
    %117 = vector.broadcast %cst_33 : f32 to vector<16x1xf32>
    %118 = arith.addf %114, %117 : vector<16x1xf32>
    %119 = math.rsqrt %118 : vector<16x1xf32>
    %120 = vector.broadcast %119 : vector<16x1xf32> to vector<16x32xf32>
    %121 = arith.mulf %116, %120 : vector<16x32xf32>
    %122 = vector.broadcast %5 : vector<1x32xf32> to vector<16x32xf32>
    %123 = arith.mulf %121, %122 : vector<16x32xf32>
    %124 = vector.broadcast %6 : vector<1x32xf32> to vector<16x32xf32>
    %125 = arith.addf %123, %124 : vector<16x32xf32>
    %126 = vector.extract_strided_slice %1 {offsets = [0, 128], sizes = [32, 64], strides = [1, 1]} : vector<32x192xf32> to vector<32x64xf32>
    %cst_34 = arith.constant dense<0.000000e+00> : vector<16x64xf32>
    %127 = tpu.matmul %125, %126, %cst_34 {dimension_numbers = #tpu.dot_dimension_numbers<[1], [0], [0], [1], [0, 0, 1, 1], [], []>} : vector<16x32xf32>, vector<32x64xf32>, vector<16x64xf32> -> vector<16x64xf32>
    %128 = vector.broadcast %7 : vector<1x64xf32> to vector<16x64xf32>
    %129 = arith.addf %127, %128 : vector<16x64xf32>
    %cst_35 = arith.constant 0.000000e+00 : f32
    %130 = vector.broadcast %cst_35 : f32 to vector<16x64xf32>
    %131 = arith.maximumf %129, %130 : vector<16x64xf32>
    %c0_36 = arith.constant 0 : index
    %c0_37 = arith.constant 0 : index
    %132 = vector.load %arg2[%c0_36, %c0_37] : memref<64x32xf32, #tpu.memory_space<vmem>>, vector<64x32xf32>
    %cst_38 = arith.constant dense<0.000000e+00> : vector<16x32xf32>
    %133 = tpu.matmul %131, %132, %cst_38 {dimension_numbers = #tpu.dot_dimension_numbers<[1], [0], [0], [1], [0, 0, 1, 1], [], []>} : vector<16x64xf32>, vector<64x32xf32>, vector<16x32xf32> -> vector<16x32xf32>
    %134 = vector.broadcast %8 : vector<1x32xf32> to vector<16x32xf32>
    %135 = arith.addf %133, %134 : vector<16x32xf32>
    %136 = arith.addf %125, %135 : vector<16x32xf32>
    %cst_39 = arith.constant dense<0.000000e+00> : vector<16xf32>
    %137 = vector.multi_reduction <add>, %136, %cst_39 [1] : vector<16x32xf32> to vector<16xf32>
    %138 = vector.shape_cast %137 : vector<16xf32> to vector<16x1xf32>
    %cst_40 = arith.constant 3.200000e+01 : f32
    %139 = vector.broadcast %cst_40 : f32 to vector<16x1xf32>
    %140 = arith.divf %138, %139 : vector<16x1xf32>
    %141 = vector.broadcast %140 : vector<16x1xf32> to vector<16x32xf32>
    %142 = arith.subf %136, %141 : vector<16x32xf32>
    %143 = arith.mulf %142, %142 : vector<16x32xf32>
    %cst_41 = arith.constant dense<0.000000e+00> : vector<16xf32>
    %144 = vector.multi_reduction <add>, %143, %cst_41 [1] : vector<16x32xf32> to vector<16xf32>
    %145 = vector.shape_cast %144 : vector<16xf32> to vector<16x1xf32>
    %cst_42 = arith.constant 3.200000e+01 : f32
    %146 = vector.broadcast %cst_42 : f32 to vector<16x1xf32>
    %147 = arith.divf %145, %146 : vector<16x1xf32>
    %148 = vector.broadcast %140 : vector<16x1xf32> to vector<16x32xf32>
    %149 = arith.subf %136, %148 : vector<16x32xf32>
    %cst_43 = arith.constant 9.99999974E-6 : f32
    %150 = vector.broadcast %cst_43 : f32 to vector<16x1xf32>
    %151 = arith.addf %147, %150 : vector<16x1xf32>
    %152 = math.rsqrt %151 : vector<16x1xf32>
    %153 = vector.broadcast %152 : vector<16x1xf32> to vector<16x32xf32>
    %154 = arith.mulf %149, %153 : vector<16x32xf32>
    %155 = vector.broadcast %9 : vector<1x32xf32> to vector<16x32xf32>
    %156 = arith.mulf %154, %155 : vector<16x32xf32>
    %157 = vector.broadcast %10 : vector<1x32xf32> to vector<16x32xf32>
    %158 = arith.addf %156, %157 : vector<16x32xf32>
    %c0_44 = arith.constant 0 : index
    %c0_45 = arith.constant 0 : index
    %159 = vector.load %arg4[%c0_44, %c0_45] : memref<16x32xf32, #tpu.memory_space<vmem>>, vector<16x32xf32>
    tpu.vector_store %arg4[%c0_44, %c0_45], %158 {strides = array<i32>} : memref<16x32xf32, #tpu.memory_space<vmem>>, vector<16x32xf32>,
    return
  }
}

</mosaic_0001>

<bundles_post_ra>
// kernel: tpu_custom_call.1
= control target key start
LH: loop header
LB: loop body
LE: loop exit
PB: predicated region body
PF: predicated region fallthrough
CT: control target
= control target key end

     0   :  { %vm33_vm0 = vcmask 261120   ;;  %s2456_s0 = inlined_call_operand.vmem [shape: f32[16,32], index: 0, kind: input, shape index: {}]   ;;  %s2457_s1 = inlined_call_operand.vmem [shape: f32[32,192], index: 1, kind: input, shape index: {}]   ;;  %s2458_s2 = inlined_call_operand.vmem [shape: f32[64,32], index: 2, kind: input, shape index: {}]   ;;  %s2459_s3 = inlined_call_operand.vmem [shape: f32[8,128], index: 3, kind: input, shape index: {}]   ;;  %s2460_s4 = inlined_call_operand.hbm [shape: f32[16,32], index: 4, kind: output, shape index: {}]  }
   0x1   :  { %v2204_v0 = vld [vmem:[%s2457_s1 + $0x30] sm:$0xff]  ;;  %v2209_v1 = vld [vmem:[%s2457_s1 + $0x20] sm:$0xff] }
   0x2   :  { %1944 = vmatprep.subr.mxu1 %v2204_v0  ;;  %v2215_v2 = vld [vmem:[%s2456_s0] sm:$0xff]  ;;  %v2221_v3 = vld [vmem:[%s2457_s1 + $0x10] sm:$0xff] }
   0x3   :  { %1945 = vmatpush3.msra.mxu1 %v2204_v0  ;;  %1952 = vmatprep.mubr.msk.f32.mxu1 %vm33_vm0, %v2215_v2 }
   0x4   :  { %9 = vsyncpa [#allocation4], 0  ;;  %1946 = vmatprep.subr.mxu1 %v2209_v1  ;;  %v2230_v4 = vld [vmem:[%s2457_s1] sm:$0xff]  ;;  %v2237_v5 = vld [vmem:[%s2456_s0 + $0x8] sm:$0xff]  ;;  %v2157_v6 = vmov 0.0   ;;  %v29_v7 = vlaneseq  ;;  %vm2158_vm1 = vmmov 0  }
   0x5   :  { %1947 = vmatpush3.msra.mxu1 %v2209_v1  ;;  %1965 = vmatprep.subr.mxu0 %v2157_v6  ;;  %v2255_v10 = vld [vmem:[%s2459_s3] sm:$0xff]  ;;  %s2159_s28 = smov 96   ;;  %vm118_vm2 = vcmask 64512   ;;  %s2160_s3 = smov 64   ;;  %vm784_vm3 = vcmask 130112   ;;  %vm1125_vm4 = vcmask 195712  }
   0x6   :  { %1948 = vmatprep.subr.mxu1 %v2221_v3  ;;  %v2245_v8 = vshrl.u32 %v29_v7, 7  ;;  %1967 = vmatprep.mubr.msk.f32.mxu0 %vm2158_vm1, %v2157_v6  ;;  %s2161_s29 = smov 88   ;;  %s2162_s30 = smov 120   ;;  %vm1466_vm5 = vcmask 261312   ;;  %vm1712_vm6 = vcmask 523264  }
   0x7   :  { %1949 = vmatpush3.msra.mxu1 %v2221_v3  ;;  %s2163_s5 = smov 56   ;;  %s2164_s6 = smov 80  }
   0x8   :  { %1950 = vmatprep.subr.mxu1 %v2230_v4  ;;  %v31_v9 = vsub.s32 0, %v2245_v8  ;;  %s2165_s7 = smov 112   ;;  %s2166_s8 = smov 48  }
   0x9   :  { %1951 = vmatpush3.msra.mxu1 %v2230_v4  ;;  %s2167_s9 = smov 72   ;;  %s2168_s10 = smov 104  }
   0xa   :  { %1953 = vmatmul.mubr.msk.f32.vlgmr.msra.gmra.mxu1 %vm33_vm0, %v2237_v5  ;;  %1955 = vmatprep.subr.mxu1 %v2157_v6  ;;  %v32_v12 = vrot.slane %v2255_v10, %v31_v9  ;;  %s2169_s11 = smov 40   ;;  %s2170_s12 = smov 8  }
   0xb   :  { %1957 = vmatprep.mubr.msk.f32.mxu1 %vm2158_vm1, %v2157_v6  ;;  %s2171_s13 = smov 16   ;;  %s2172_s14 = smov 24  }
   0xc   :  { %s2173_s15 = smov 32  }
  0xca   :  { %v1954_v11 = vpop.f32.mrf.mxu1 }
  0xcb   :  { %v2261_v15 = vadd.f32 %v1954_v11, %v32_v12 }
  0xcc   :  { %v106_v13 = vpop.f32.mrf.mxu1 }
  0xcd   :  { %v2258_v14 = vadd.f32 %v106_v13, %v32_v12 }
  0xcf   :  { %116 = vrot.lane.b32.xlu0 %v2258_v14, %s2159_s28 }
  0xd3   :  { %194 = vrot.lane.b32.xlu0 %v2261_v15, %s2159_s28 }
 0x141   :  { %v117_v16 = vpop.permute.xlu0 %116 }
 0x142   :  { %1956 = vmatpush3.xpose.msk.msra.mxu1 %vm118_vm2, %v117_v16 }
 0x143   :  { %1960 = vmatprep.subr.mxu1 %v2157_v6 }
 0x145   :  { %1958 = vmatmul.mubr.msk.f32.vlgmr.msra.gmra.mxu1 %vm118_vm2, %v2258_v14  ;;  %v195_v17 = vpop.permute.xlu0 %194 }
 0x146   :  { %1961 = vmatpush3.xpose.msk.msra.mxu1 %vm118_vm2, %v195_v17  ;;  %1962 = vmatprep.mubr.msk.f32.mxu1 %vm2158_vm1, %v2157_v6 }
 0x147   :  { %1970 = vmatprep.subr.mxu1 %v2157_v6 }
 0x149   :  { %1963 = vmatmul.mubr.msk.f32.vlgmr.msra.gmra.mxu1 %vm118_vm2, %v2261_v15 }
 0x14a   :  { %1972 = vmatprep.mubr.msk.f32.mxu1 %vm2158_vm1, %v2157_v6 }
 0x205   :  { %v189_v18 = vpop.f32.mrf.mxu1 }
 0x206   :  { %v270_v19 = vsel %vm118_vm2, %v189_v18, -inf }
 0x207   :  { %271 = vmax.xlane.f32.xlu1 %v270_v19  ;;  %v1959_v20 = vpop.f32.mrf.mxu1 }
 0x209   :  { %v266_v21 = vpop.f32.mrf.mxu1 }
 0x20a   :  { %v273_v22 = vsel %vm118_vm2, %v266_v21, -inf }
 0x20b   :  { %274 = vmax.xlane.f32.xlu1 %v273_v22  ;;  %v1964_v23 = vpop.f32.mrf.mxu1 }
 0x21c   :  { %292 = vrot.lane.b32.xlu1 %v2258_v14, %s2160_s3 }
 0x220   :  { %368 = vrot.lane.b32.xlu1 %v2261_v15, %s2160_s3 }
 0x224   :  { %448 = vrot.lane.b32.xlu1 %v2258_v14, %s2161_s29 }
 0x228   :  { %526 = vrot.lane.b32.xlu1 %v2261_v15, %s2161_s29 }
 0x290   :  { %v272_v24 = vpop.xlane.xlu1 %271 }
 0x291   :  { %v276_v25 = vsub.f32 %v189_v18, %v272_v24 }
 0x293   :  { %v278_v26 = vmul.f32 1.442695, %v276_v25 }
 0x294   :  { %v275_v27 = vpop.xlane.xlu1 %274 }
 0x295   :  { %2095 = vpow2.f32 %v278_v26  ;;  %v277_v28 = vsub.f32 %v266_v21, %v275_v27 }
 0x297   :  { %v280_v29 = vmul.f32 1.442695, %v277_v28 }
 0x298   :  { %v293_v30 = vpop.permute.xlu1 %292 }
 0x299   :  { %2097 = vpow2.f32 %v280_v29  ;;  %1966 = vmatpush3.msra.mxu0 %v293_v30 }
 0x29a   :  { %1975 = vmatprep.subr.mxu0 %v2157_v6 }
 0x29c   :  { %v369_v31 = vpop.permute.xlu1 %368 }
 0x29d   :  { %1971 = vmatpush3.msra.mxu1 %v369_v31 }
 0x29e   :  { %1980 = vmatprep.subr.mxu1 %v2157_v6 }
 0x2a0   :  { %v449_v36 = vpop.permute.xlu1 %448 }
 0x2a2   :  { %v2096_v32 = vpop.eup %2095 }
 0x2a3   :  { %v282_v33 = vsel %vm118_vm2, %v2096_v32, 0.0 }
 0x2a4   :  { %283 = vadd.xlane.f32.xlu0 %v282_v33  ;;  %v527_v37 = vpop.permute.xlu1 %526 }
 0x2a6   :  { %v2098_v34 = vpop.eup %2097 }
 0x2a7   :  { %v285_v35 = vsel %vm118_vm2, %v2098_v34, 0.0 }
 0x2a8   :  { %286 = vadd.xlane.f32.xlu1 %v285_v35 }
 0x2b9   :  { %524 = vrot.lane.b32.xlu1 %v2261_v15, %s2162_s30 }
 0x2ba   :  { %446 = vrot.lane.b32.xlu0 %v2258_v14, %s2162_s30 }
 0x32d   :  { %v284_v38 = vpop.xlane.xlu0 %283 }
 0x32e   :  { %2099 = vrcp.f32 %v284_v38 }
 0x331   :  { %v287_v39 = vpop.xlane.xlu1 %286  ;;  %v447_v44 = vpop.permute.xlu0 %446 }
 0x332   :  { %2101 = vrcp.f32 %v287_v39 }
 0x335   :  { %v525_v45 = vpop.permute.xlu1 %524 }
 0x33b   :  { %v2100_v40 = vpop.eup %2099 }
 0x33c   :  { %v290_v41 = vmul.f32 %v2100_v40, %v2096_v32 }
 0x33e   :  { %1968 = vmatmul.mubr.msk.f32.vlgmr.msra.gmra.mxu0 %vm118_vm2, %v290_v41 }
 0x33f   :  { %v2102_v42 = vpop.eup %2101  ;;  %1976 = vmatpush3.xpose.msk.msra.mxu0 %vm118_vm2, %v449_v36  ;;  %1977 = vmatprep.mubr.msk.f32.mxu0 %vm2158_vm1, %v2157_v6 }
 0x340   :  { %v291_v43 = vmul.f32 %v2102_v42, %v2098_v34  ;;  %1985 = vmatprep.subr.mxu0 %v2157_v6 }
 0x342   :  { %1973 = vmatmul.mubr.msk.f32.vlgmr.msra.gmra.mxu1 %vm118_vm2, %v291_v43  ;;  %1978 = vmatmul.mubr.msk.f32.vlgmr.msra.gmra.mxu0 %vm118_vm2, %v447_v44 }
 0x343   :  { %1981 = vmatpush3.xpose.msk.msra.mxu1 %vm118_vm2, %v527_v37  ;;  %1982 = vmatprep.mubr.msk.f32.mxu1 %vm2158_vm1, %v2157_v6 }
 0x344   :  { %1990 = vmatprep.subr.mxu1 %v2157_v6  ;;  %1987 = vmatprep.mubr.msk.f32.mxu0 %vm2158_vm1, %v2157_v6 }
 0x346   :  { %1983 = vmatmul.mubr.msk.f32.vlgmr.msra.gmra.mxu1 %vm118_vm2, %v525_v45 }
 0x347   :  { %1992 = vmatprep.mubr.msk.f32.mxu1 %vm2158_vm1, %v2157_v6 }
 0x3fe   :  { %v364_v46 = vpop.f32.mrf.mxu0 }
 0x3ff   :  { %444 = vst.msk [vmem:[#allocation2] sm:$0xff] %vm118_vm2, %v364_v46 }
 0x400   :  { %v1969_v47 = vpop.f32.mrf.mxu0 }
 0x402   :  { %v440_v48 = vpop.f32.mrf.mxu1  ;;  %v520_v49 = vpop.f32.mrf.mxu0 }
 0x403   :  { %445 = vst.msk [vmem:[#allocation2 + $0x8] sm:$0xff] %vm118_vm2, %v440_v48  ;;  %v602_v50 = vsel %vm118_vm2, %v520_v49, -inf }
 0x404   :  { %v1974_v51 = vpop.f32.mrf.mxu1  ;;  %603 = vmax.xlane.f32.xlu1 %v602_v50  ;;  %v1979_v52 = vpop.f32.mrf.mxu0 }
 0x406   :  { %v598_v53 = vpop.f32.mrf.mxu1 }
 0x407   :  { %v605_v54 = vsel %vm118_vm2, %v598_v53, -inf }
 0x408   :  { %606 = vmax.xlane.f32.xlu0 %v605_v54  ;;  %v1984_v55 = vpop.f32.mrf.mxu1 }
 0x415   :  { %624 = vrot.lane.b32.xlu1 %v2258_v14, %s2163_s5 }
 0x419   :  { %789 = vrot.lane.b32.xlu1 %v2258_v14, %s2164_s6 }
 0x41d   :  { %867 = vrot.lane.b32.xlu1 %v2261_v15, %s2164_s6 }
 0x41e   :  { %700 = vrot.lane.b32.xlu0 %v2261_v15, %s2163_s5 }
 0x422   :  { %787 = vrot.lane.b32.xlu0 %v2258_v14, %s2165_s7 }
 0x48d   :  { %v604_v56 = vpop.xlane.xlu1 %603 }
 0x48e   :  { %v608_v57 = vsub.f32 %v520_v49, %v604_v56 }
 0x490   :  { %v610_v58 = vmul.f32 1.442695, %v608_v57 }
 0x491   :  { %v625_v59 = vpop.permute.xlu1 %624  ;;  %v607_v60 = vpop.xlane.xlu0 %606 }
 0x492   :  { %2103 = vpow2.f32 %v610_v58  ;;  %v609_v61 = vsub.f32 %v598_v53, %v607_v60  ;;  %1986 = vmatpush3.msra.mxu0 %v625_v59 }
 0x493   :  { %1995 = vmatprep.subr.mxu0 %v2157_v6 }
 0x494   :  { %v612_v62 = vmul.f32 1.442695, %v609_v61 }
 0x495   :  { %v701_v63 = vpop.permute.xlu0 %700  ;;  %v790_v13 = vpop.permute.xlu1 %789 }
 0x496   :  { %2105 = vpow2.f32 %v612_v62  ;;  %1991 = vmatpush3.msra.mxu1 %v701_v63 }
 0x497   :  { %2000 = vmatprep.subr.mxu1 %v2157_v6 }
 0x499   :  { %v868_v16 = vpop.permute.xlu1 %867  ;;  %v788_v23 = vpop.permute.xlu0 %787 }
 0x49f   :  { %v2104_v7 = vpop.eup %2103 }
 0x4a0   :  { %v614_v9 = vsel %vm118_vm2, %v2104_v7, 0.0 }
 0x4a1   :  { %615 = vadd.xlane.f32.xlu1 %v614_v9 }
 0x4a3   :  { %v2106_v11 = vpop.eup %2105 }
 0x4a4   :  { %v617_v12 = vsel %vm118_vm2, %v2106_v11, 0.0 }
 0x4a5   :  { %618 = vadd.xlane.f32.xlu1 %v617_v12 }
 0x4b6   :  { %865 = vrot.lane.b32.xlu1 %v2261_v15, %s2165_s7 }
 0x52a   :  { %v616_v17 = vpop.xlane.xlu1 %615 }
 0x52b   :  { %2107 = vrcp.f32 %v616_v17 }
 0x52e   :  { %v619_v18 = vpop.xlane.xlu1 %618 }
 0x52f   :  { %2109 = vrcp.f32 %v619_v18 }
 0x532   :  { %v866_v24 = vpop.permute.xlu1 %865 }
 0x538   :  { %v2108_v19 = vpop.eup %2107 }
 0x539   :  { %v622_v20 = vmul.f32 %v2108_v19, %v2104_v7 }
 0x53b   :  { %1988 = vmatmul.mubr.msk.f32.vlgmr.msra.gmra.mxu0 %vm118_vm2, %v622_v20 }
 0x53c   :  { %v2110_v21 = vpop.eup %2109  ;;  %1996 = vmatpush3.xpose.msk.msra.mxu0 %vm118_vm2, %v790_v13  ;;  %1997 = vmatprep.mubr.msk.f32.mxu0 %vm2158_vm1, %v2157_v6 }
 0x53d   :  { %v623_v22 = vmul.f32 %v2110_v21, %v2106_v11  ;;  %2005 = vmatprep.subr.mxu0 %v2157_v6 }
 0x53f   :  { %1993 = vmatmul.mubr.msk.f32.vlgmr.msra.gmra.mxu1 %vm118_vm2, %v623_v22  ;;  %1998 = vmatmul.mubr.msk.f32.vlgmr.msra.gmra.mxu0 %vm118_vm2, %v788_v23 }
 0x540   :  { %2001 = vmatpush3.xpose.msk.msra.mxu1 %vm118_vm2, %v868_v16  ;;  %2002 = vmatprep.mubr.msk.f32.mxu1 %vm2158_vm1, %v2157_v6 }
 0x541   :  { %2010 = vmatprep.subr.mxu1 %v2157_v6  ;;  %2007 = vmatprep.mubr.msk.f32.mxu0 %vm2158_vm1, %v2157_v6 }
 0x543   :  { %2003 = vmatmul.mubr.msk.f32.vlgmr.msra.gmra.mxu1 %vm118_vm2, %v866_v24 }
 0x544   :  { %2012 = vmatprep.mubr.msk.f32.mxu1 %vm2158_vm1, %v2157_v6 }
 0x5fb   :  { %v2334_v25 = vpop.f32.mrf.mxu0 }
 0x5fd   :  { %v1989_v26 = vpop.f32.mrf.mxu0 }
 0x5ff   :  { %v2336_v27 = vpop.f32.mrf.mxu1  ;;  %v861_v28 = vpop.f32.mrf.mxu0 }
 0x600   :  { %v943_v29 = vsel %vm118_vm2, %v861_v28, -inf }
 0x601   :  { %v1994_v30 = vpop.f32.mrf.mxu1  ;;  %944 = vmax.xlane.f32.xlu0 %v943_v29  ;;  %v1999_v31 = vpop.f32.mrf.mxu0 }
 0x603   :  { %v939_v32 = vpop.f32.mrf.mxu1 }
 0x604   :  { %v946_v33 = vsel %vm118_vm2, %v939_v32, -inf }
 0x605   :  { %947 = vmax.xlane.f32.xlu1 %v946_v33  ;;  %v2004_v34 = vpop.f32.mrf.mxu1 }
 0x616   :  { %965 = vrot.lane.b32.xlu1 %v2258_v14, %s2166_s8 }
 0x617   :  { %1041 = vrot.lane.b32.xlu0 %v2261_v15, %s2166_s8 }
 0x61a   :  { %1130 = vrot.lane.b32.xlu1 %v2258_v14, %s2167_s9 }
 0x61e   :  { %1208 = vrot.lane.b32.xlu1 %v2261_v15, %s2167_s9 }
 0x622   :  { %1206 = vrot.lane.b32.xlu1 %v2261_v15, %s2168_s10 }
 0x68a   :  { %v945_v35 = vpop.xlane.xlu0 %944 }
 0x68b   :  { %v949_v36 = vsub.f32 %v861_v28, %v945_v35 }
 0x68d   :  { %v951_v37 = vmul.f32 1.442695, %v949_v36 }
 0x68e   :  { %v948_v38 = vpop.xlane.xlu1 %947  ;;  %v1042_v39 = vpop.permute.xlu0 %1041 }
 0x68f   :  { %2111 = vpow2.f32 %v951_v37  ;;  %v950_v40 = vsub.f32 %v939_v32, %v948_v38  ;;  %2011 = vmatpush3.msra.mxu1 %v1042_v39 }
 0x690   :  { %2020 = vmatprep.subr.mxu1 %v2157_v6 }
 0x691   :  { %v953_v41 = vmul.f32 1.442695, %v950_v40 }
 0x692   :  { %v966_v42 = vpop.permute.xlu1 %965 }
 0x693   :  { %2113 = vpow2.f32 %v953_v41  ;;  %2006 = vmatpush3.msra.mxu0 %v966_v42 }
 0x694   :  { %2015 = vmatprep.subr.mxu0 %v2157_v6 }
 0x696   :  { %v1131_v49 = vpop.permute.xlu1 %1130 }
 0x69a   :  { %v1209_v53 = vpop.permute.xlu1 %1208 }
 0x69c   :  { %v2112_v43 = vpop.eup %2111 }
 0x69d   :  { %v955_v44 = vsel %vm118_vm2, %v2112_v43, 0.0 }
 0x69e   :  { %956 = vadd.xlane.f32.xlu0 %v955_v44  ;;  %v1207_v56 = vpop.permute.xlu1 %1206 }
 0x6a0   :  { %v2114_v45 = vpop.eup %2113 }
 0x6a1   :  { %v958_v46 = vsel %vm118_vm2, %v2114_v45, 0.0 }
 0x6a2   :  { %959 = vadd.xlane.f32.xlu0 %v958_v46 }
 0x6b8   :  { %1128 = vrot.lane.b32.xlu0 %v2258_v14, %s2168_s10 }
 0x727   :  { %v957_v47 = vpop.xlane.xlu0 %956 }
 0x728   :  { %2115 = vrcp.f32 %v957_v47 }
 0x72b   :  { %v960_v48 = vpop.xlane.xlu0 %959 }
 0x72c   :  { %2117 = vrcp.f32 %v960_v48 }
 0x72f   :  { %v1129_v55 = vpop.permute.xlu0 %1128 }
 0x735   :  { %v2116_v50 = vpop.eup %2115 }
 0x736   :  { %v963_v51 = vmul.f32 %v2116_v50, %v2112_v43 }
 0x738   :  { %2008 = vmatmul.mubr.msk.f32.vlgmr.msra.gmra.mxu0 %vm118_vm2, %v963_v51 }
 0x739   :  { %v2118_v52 = vpop.eup %2117  ;;  %2016 = vmatpush3.xpose.msk.msra.mxu0 %vm118_vm2, %v1131_v49  ;;  %2017 = vmatprep.mubr.msk.f32.mxu0 %vm2158_vm1, %v2157_v6 }
 0x73a   :  { %v964_v54 = vmul.f32 %v2118_v52, %v2114_v45  ;;  %2025 = vmatprep.subr.mxu0 %v2157_v6 }
 0x73c   :  { %2013 = vmatmul.mubr.msk.f32.vlgmr.msra.gmra.mxu1 %vm118_vm2, %v964_v54  ;;  %2018 = vmatmul.mubr.msk.f32.vlgmr.msra.gmra.mxu0 %vm118_vm2, %v1129_v55 }
 0x73d   :  { %2021 = vmatpush3.xpose.msk.msra.mxu1 %vm118_vm2, %v1209_v53  ;;  %2022 = vmatprep.mubr.msk.f32.mxu1 %vm2158_vm1, %v2157_v6 }
 0x73e   :  { %2030 = vmatprep.subr.mxu1 %v2157_v6  ;;  %2027 = vmatprep.mubr.msk.f32.mxu0 %vm2158_vm1, %v2157_v6 }
 0x740   :  { %2023 = vmatmul.mubr.msk.f32.vlgmr.msra.gmra.mxu1 %vm118_vm2, %v1207_v56 }
 0x741   :  { %2032 = vmatprep.mubr.msk.f32.mxu1 %vm2158_vm1, %v2157_v6 }
 0x7f8   :  { %v1037_v57 = vpop.f32.mrf.mxu0 }
 0x7fa   :  { %v2009_v58 = vpop.f32.mrf.mxu0 }
 0x7fc   :  { %v1113_v59 = vpop.f32.mrf.mxu1  ;;  %v1202_v60 = vpop.f32.mrf.mxu0 }
 0x7fd   :  { %v1284_v61 = vsel %vm118_vm2, %v1202_v60, -inf }
 0x7fe   :  { %v2014_v62 = vpop.f32.mrf.mxu1  ;;  %1285 = vmax.xlane.f32.xlu0 %v1284_v61  ;;  %v2019_v63 = vpop.f32.mrf.mxu0  ;;  %v23_v61 = vld [vmem:[%s2457_s1 + $0x18] sm:$0xff] }
 0x7ff   :  { %v21_v62 = vld [vmem:[%s2457_s1 + $0x8] sm:$0xff]  ;;  %v1707_v63 = vld [vmem:[%s2458_s2 + $0x38] sm:$0xff] }
 0x800   :  { %v1280_v7 = vpop.f32.mrf.mxu1 }
 0x801   :  { %v1287_v9 = vsel %vm118_vm2, %v1280_v7, -inf }
 0x802   :  { %1288 = vmax.xlane.f32.xlu1 %v1287_v9  ;;  %v2024_v11 = vpop.f32.mrf.mxu1  ;;  %v1705_v9 = vld [vmem:[%s2458_s2 + $0x28] sm:$0xff] }
 0x803   :  { %v1704_v11 = vld [vmem:[%s2458_s2 + $0x20] sm:$0xff] }
 0x813   :  { %1306 = vrot.lane.b32.xlu1 %v2258_v14, %s2169_s11 }
 0x817   :  { %778 = vrot.lane.b32.xlu1 %v2334_v25, %s2170_s12 }
 0x81b   :  { %780 = vrot.lane.b32.xlu1 %v2336_v27, %s2170_s12 }
 0x81f   :  { %1121 = vrot.lane.b32.xlu1 %v1113_v59, %s2171_s13 }
 0x887   :  { %v1286_v6 = vpop.xlane.xlu0 %1285 }
 0x888   :  { %v1290_v12 = vsub.f32 %v1202_v60, %v1286_v6  ;;  %v25_v60 = vld [vmem:[%s2457_s1 + $0x28] sm:$0xff] }
 0x88a   :  { %v1292_v13 = vmul.f32 1.442695, %v1290_v12 }
 0x88b   :  { %v1289_v16 = vpop.xlane.xlu1 %1288 }
 0x88c   :  { %2119 = vpow2.f32 %v1292_v13  ;;  %v1291_v17 = vsub.f32 %v1280_v7, %v1289_v16  ;;  %v1706_v7 = vld [vmem:[%s2458_s2 + $0x30] sm:$0xff] }
 0x88e   :  { %v1294_v18 = vmul.f32 1.442695, %v1291_v17 }
 0x88f   :  { %v1307_v19 = vpop.permute.xlu1 %1306 }
 0x890   :  { %2121 = vpow2.f32 %v1294_v18  ;;  %2026 = vmatpush3.msra.mxu0 %v1307_v19  ;;  %v1603_v19 = vsub.s32 2, %v2245_v8 }
 0x893   :  { %v779_v14 = vpop.permute.xlu1 %778 }
 0x894   :  { %785 = vst.msk [vmem:[#allocation2] sm:$0xff] %vm784_vm3, %v779_v14  ;;  %v1609_v14 = vsub.s32 3, %v2245_v8 }
 0x897   :  { %v781_v20 = vpop.permute.xlu1 %780 }
 0x898   :  { %786 = vst.msk [vmem:[#allocation2 + $0x8] sm:$0xff] %vm784_vm3, %v781_v20  ;;  %v1604_v20 = vrot.slane %v2255_v10, %v1603_v19 }
 0x899   :  { %v2120_v21 = vpop.eup %2119 }
 0x89a   :  { %v1296_v22 = vsel %vm118_vm2, %v2120_v21, 0.0 }
 0x89b   :  { %v1122_v23 = vpop.permute.xlu1 %1121  ;;  %1297 = vadd.xlane.f32.xlu0 %v1296_v22 }
 0x89c   :  { %1127 = vst.msk [vmem:[#allocation2 + $0x8] sm:$0xff] %vm1125_vm4, %v1122_v23  ;;  %v1610_v23 = vrot.slane %v2255_v10, %v1609_v14 }
 0x89d   :  { %v2122_v24 = vpop.eup %2121 }
 0x89e   :  { %v1299_v25 = vsel %vm118_vm2, %v2122_v24, 0.0 }
 0x89f   :  { %1300 = vadd.xlane.f32.xlu0 %v1299_v25 }
 0x8b5   :  { %1382 = vrot.lane.b32.xlu0 %v2261_v15, %s2169_s11 }
 0x8b9   :  { %1119 = vrot.lane.b32.xlu0 %v1037_v57, %s2171_s13 }
 0x924   :  { %v1298_v26 = vpop.xlane.xlu0 %1297 }
 0x925   :  { %2123 = vrcp.f32 %v1298_v26 }
 0x928   :  { %v1301_v27 = vpop.xlane.xlu0 %1300 }
 0x929   :  { %2125 = vrcp.f32 %v1301_v27 }
 0x92c   :  { %v1383_v28 = vpop.permute.xlu0 %1382 }
 0x92d   :  { %2031 = vmatpush3.msra.mxu1 %v1383_v28 }
 0x930   :  { %v1120_v29 = vpop.permute.xlu0 %1119 }
 0x931   :  { %1126 = vst.msk [vmem:[#allocation2] sm:$0xff] %vm1125_vm4, %v1120_v29 }
 0x932   :  { %v2124_v30 = vpop.eup %2123 }
 0x933   :  { %v1304_v31 = vmul.f32 %v2124_v30, %v2120_v21  ;;  %v1703_v30 = vld [vmem:[%s2458_s2 + $0x18] sm:$0xff] }
 0x935   :  { %2028 = vmatmul.mubr.msk.f32.vlgmr.msra.gmra.mxu0 %vm118_vm2, %v1304_v31  ;;  %v1702_v31 = vld [vmem:[%s2458_s2 + $0x10] sm:$0xff] }
 0x936   :  { %v2126_v32 = vpop.eup %2125 }
 0x937   :  { %v1305_v33 = vmul.f32 %v2126_v32, %v2122_v24  ;;  %v1701_v32 = vld [vmem:[%s2458_s2 + $0x8] sm:$0xff] }
 0x939   :  { %2033 = vmatmul.mubr.msk.f32.vlgmr.msra.gmra.mxu1 %vm118_vm2, %v1305_v33  ;;  %v1700_v33 = vld [vmem:[%s2458_s2] sm:$0xff]  ;;  %s2174_s2 = smov [#allocation3]  }
 0x93a   :  { %s1841_s11 = sshll.u32 %s2174_s2, 4  ;;  %s1842_s11 = int_to_ptr.vmem [resolvable:$true] %s1841_s11 }
 0x93b   :  { %s2135_s13 = scalar_lea.vmem %s1842_s11, 256  ;;  %p2140_p1 = scmp.lt.s32.totalorder %s1842_s11, %s1842_s11 }
 0x93c   :  { %p2136_p0 = scmp.ne.s32.totalorder %s1842_s11, %s2135_s13  ;;  %p2141_p2 = scmp.lt.s32.totalorder %s2135_s13, %s2135_s13 }
 0x93e   :  { %p2142_p3 = por %p2141_p2, %p2140_p1 }
 0x940   :  { %p2143_p4 = pnand %p2142_p3, %p2136_p0 }
 0x9f5   :  { %v1378_v34 = vpop.f32.mrf.mxu0 }
 0x9f6   :  { %1460 = vrot.lane.b32.xlu0 %v1378_v34, %s2172_s14  ;;  %v1615_v34 = vsub.s32 4, %v2245_v8 }
 0x9f7   :  { %v2029_v15 = vpop.f32.mrf.mxu0 }
 0x9f8   :  { %v1616_v15 = vrot.slane %v2255_v10, %v1615_v34 }
 0x9f9   :  { %v1454_v35 = vpop.f32.mrf.mxu1 }
 0x9fa   :  { %1462 = vrot.lane.b32.xlu1 %v1454_v35, %s2172_s14  ;;  %1485 = vrot.lane.b32.xlu0 %v2204_v0, %s2173_s15 }
 0x9fb   :  { %v2034_v36 = vpop.f32.mrf.mxu1 }
 0x9fe   :  { %1483 = vrot.lane.b32.xlu1 %v2209_v1, %s2173_s15  ;;  %1481 = vrot.lane.b32.xlu0 %v2221_v3, %s2173_s15  ;;  %v1473_v3 = vsub.s32 1, %v2245_v8 }
 0xa02   :  { %1479 = vrot.lane.b32.xlu1 %v2230_v4, %s2173_s15  ;;  %v1474_v4 = vrot.slane %v2255_v10, %v1473_v3 }
 0xa68   :  { %v1461_v37 = vpop.permute.xlu0 %1460 }
 0xa69   :  { %1467 = vst.msk [vmem:[#allocation2] sm:$0xff] %vm1466_vm5, %v1461_v37 }
 0xa6c   :  { %v1463_v38 = vpop.permute.xlu1 %1462  ;;  %v1486_v39 = vpop.permute.xlu0 %1485 }
 0xa6d   :  { %1468 = vst.msk [vmem:[#allocation2 + $0x8] sm:$0xff] %vm1466_vm5, %v1463_v38  ;;  %2035 = vmatprep.subr.mxu0 %v1486_v39 }
 0xa6e   :  { %2036 = vmatpush3.msra.mxu0 %v1486_v39 }
 0xa70   :  { %v1484_v40 = vpop.permute.xlu1 %1483  ;;  %v1469_v41 = vld [vmem:[#allocation2] sm:$0xff]  ;;  %v1482_v42 = vpop.permute.xlu0 %1481 }
 0xa71   :  { %2037 = vmatprep.subr.mxu0 %v1484_v40  ;;  %2043 = vmatprep.mubr.msk.f32.mxu0 %vm33_vm0, %v1469_v41  ;;  %v1710_v41 = vsub.s32 5, %v2245_v8 }
 0xa72   :  { %2038 = vmatpush3.msra.mxu0 %v1484_v40 }
 0xa73   :  { %2039 = vmatprep.subr.mxu0 %v1482_v42 }
 0xa74   :  { %v1480_v0 = vpop.permute.xlu1 %1479  ;;  %2040 = vmatpush3.msra.mxu0 %v1482_v42  ;;  %v1470_v1 = vld [vmem:[#allocation2 + $0x8] sm:$0xff]  ;;  %v1711_v42 = vrot.slane %v2255_v10, %v1710_v41 }
 0xa75   :  { %2041 = vmatprep.subr.mxu0 %v1480_v0 }
 0xa76   :  { %2042 = vmatpush3.msra.mxu0 %v1480_v0 }
 0xa77   :  { %2044 = vmatmul.mubr.msk.f32.vlgmr.msra.gmra.mxu0 %vm33_vm0, %v1470_v1  ;;  %2057 = vmatprep.subr.mxu0 %v1707_v63 }
 0xa78   :  { %2058 = vmatpush3.msra.mxu0 %v1707_v63 }
 0xa79   :  { %2059 = vmatprep.subr.mxu0 %v1706_v7 }
 0xa7a   :  { %2060 = vmatpush3.msra.mxu0 %v1706_v7 }
 0xa7b   :  { %2061 = vmatprep.subr.mxu0 %v1705_v9 }
 0xa7c   :  { %2062 = vmatpush3.msra.mxu0 %v1705_v9 }
 0xa7d   :  { %2063 = vmatprep.subr.mxu0 %v1704_v11 }
 0xa7e   :  { %2064 = vmatpush3.msra.mxu0 %v1704_v11 }
 0xa7f   :  { %2065 = vmatprep.subr.mxu0 %v1703_v30 }
 0xa80   :  { %2066 = vmatpush3.msra.mxu0 %v1703_v30 }
 0xa81   :  { %2067 = vmatprep.subr.mxu0 %v1702_v31 }
 0xa82   :  { %2068 = vmatpush3.msra.mxu0 %v1702_v31 }
 0xa83   :  { %2069 = vmatprep.subr.mxu0 %v1701_v32 }
 0xa84   :  { %2070 = vmatpush3.msra.mxu0 %v1701_v32 }
 0xa85   :  { %2071 = vmatprep.subr.mxu0 %v1700_v33 }
 0xa86   :  { %2072 = vmatpush3.msra.mxu0 %v1700_v33 }
 0xb37   :  { %v2045_v43 = vpop.f32.mrf.mxu0 }
 0xb38   :  { %v1569_v44 = vadd.f32 %v2045_v43, %v1474_v4 }
 0xb39   :  { %v1563_v45 = vpop.f32.mrf.mxu0 }
 0xb3a   :  { %v1564_v46 = vadd.f32 %v1563_v45, %v1474_v4  ;;  %v1573_v47 = vadd.f32 %v1569_v44, %v2237_v5 }
 0xb3c   :  { %v1577_v48 = vsel %vm33_vm0, %v1573_v47, 0.0  ;;  %v1572_v49 = vadd.f32 %v1564_v46, %v2215_v2  ;;  %v27_v2 = vld [vmem:[%s2457_s1 + $0x38] sm:$0xff] }
 0xb3d   :  { %1578 = vadd.xlane.f32.xlu1 %v1577_v48  ;;  %2046 = vmatprep.subr.mxu1 %v27_v2 }
 0xb3e   :  { %v1574_v50 = vsel %vm33_vm0, %v1572_v49, 0.0  ;;  %2047 = vmatpush3.msra.mxu1 %v27_v2 }
 0xb3f   :  { %1575 = vadd.xlane.f32.xlu0 %v1574_v50  ;;  %2048 = vmatprep.subr.mxu1 %v25_v60 }
 0xb40   :  { %2049 = vmatpush3.msra.mxu1 %v25_v60 }
 0xb41   :  { %2050 = vmatprep.subr.mxu1 %v23_v61 }
 0xb42   :  { %2051 = vmatpush3.msra.mxu1 %v23_v61  ;;  %v1824_v61 = vsub.s32 6, %v2245_v8 }
 0xb43   :  { %2052 = vmatprep.subr.mxu1 %v21_v62 }
 0xb44   :  { %2053 = vmatpush3.msra.mxu1 %v21_v62  ;;  %v1830_v62 = vsub.s32 7, %v2245_v8  ;;  %v1825_v63 = vrot.slane %v2255_v10, %v1824_v61 }
 0xb46   :  { %v1831_v11 = vrot.slane %v2255_v10, %v1830_v62 }
 0xbc6   :  { %v1579_v51 = vpop.xlane.xlu1 %1578 }
 0xbc7   :  { %v1582_v52 = vmul.f32 0.03125, %v1579_v51 }
 0xbc8   :  { %v1576_v53 = vpop.xlane.xlu0 %1575 }
 0xbc9   :  { %v1581_v54 = vmul.f32 0.03125, %v1576_v53  ;;  %v1584_v55 = vsub.f32 %v1573_v47, %v1582_v52 }
 0xbcb   :  { %v1583_v56 = vsub.f32 %v1572_v49, %v1581_v54  ;;  %v1586_v59 = vmul.f32 %v1584_v55, %v1584_v55 }
 0xbcd   :  { %v1585_v57 = vmul.f32 %v1583_v56, %v1583_v56  ;;  %v1590_v5 = vsel %vm33_vm0, %v1586_v59, 0.0 }
 0xbcf   :  { %v1587_v58 = vsel %vm33_vm0, %v1585_v57, 0.0 }
 0xbd0   :  { %1588 = vadd.xlane.f32.xlu0 %v1587_v58 }
 0xbd4   :  { %1591 = vadd.xlane.f32.xlu0 %v1590_v5 }
 0xc59   :  { %v1589_v6 = vpop.xlane.xlu0 %1588 }
 0xc5a   :  { %v1593_v12 = vmul.f32 0.03125, %v1589_v6 }
 0xc5c   :  { %v1595_v13 = vadd.f32 1e-05, %v1593_v12 }
 0xc5d   :  { %v1592_v16 = vpop.xlane.xlu0 %1591 }
 0xc5e   :  { %2127 = vrsqrt.f32 %v1595_v13  ;;  %v1594_v17 = vmul.f32 0.03125, %v1592_v16 }
 0xc60   :  { %v1596_v18 = vadd.f32 1e-05, %v1594_v17 }
 0xc62   :  { %2129 = vrsqrt.f32 %v1596_v18 }
 0xc6b   :  { %v2128_v21 = vpop.eup %2127 }
 0xc6c   :  { %v1599_v22 = vmul.f32 %v2128_v21, %v1583_v56 }
 0xc6e   :  { %v1605_v24 = vmul.f32 %v1604_v20, %v1599_v22 }
 0xc6f   :  { %v2130_v25 = vpop.eup %2129 }
 0xc70   :  { %v1600_v26 = vmul.f32 %v2130_v25, %v1584_v55  ;;  %v1611_v27 = vadd.f32 %v1610_v23, %v1605_v24 }
 0xc72   :  { %v1606_v28 = vmul.f32 %v1604_v20, %v1600_v26  ;;  %2054 = vmatprep.mubr.msk.f32.mxu1 %vm33_vm0, %v1611_v27 }
 0xc74   :  { %v1612_v29 = vadd.f32 %v1610_v23, %v1606_v28 }
 0xc76   :  { %2055 = vmatmul.mubr.msk.f32.vlgmr.msra.gmra.mxu1 %vm33_vm0, %v1612_v29 }
 0xd36   :  { %v2056_v35 = vpop.f32.mrf.mxu1 }
 0xd37   :  { %v1695_v36 = vadd.f32 %v2056_v35, %v1616_v15 }
 0xd38   :  { %v1689_v37 = vpop.f32.mrf.mxu1 }
 0xd39   :  { %v1690_v38 = vadd.f32 %v1689_v37, %v1616_v15  ;;  %v1699_v40 = vmax.f32 %v1695_v36, 0.0 }
 0xd3b   :  { %v1698_v39 = vmax.f32 %v1690_v38, 0.0 }
 0xd3d   :  { %2073 = vmatprep.mubr.msk.f32.mxu0 %vm1712_vm6, %v1698_v39 }
 0xd3e   :  { %2074 = vmatmul.mubr.msk.f32.vlgmr.msra.gmra.mxu0 %vm1712_vm6, %v1699_v40 }
 0xdfe   :  { %v2075_v0 = vpop.f32.mrf.mxu0 }
 0xdff   :  { %v1791_v1 = vadd.f32 %v2075_v0, %v1711_v42 }
 0xe00   :  { %v1785_v3 = vpop.f32.mrf.mxu0 }
 0xe01   :  { %v1786_v4 = vadd.f32 %v1785_v3, %v1711_v42  ;;  %v1795_v43 = vadd.f32 %v1791_v1, %v1612_v29 }
 0xe03   :  { %v1799_v44 = vsel %vm33_vm0, %v1795_v43, 0.0  ;;  %v1794_v45 = vadd.f32 %v1786_v4, %v1611_v27 }
 0xe04   :  { %1800 = vadd.xlane.f32.xlu0 %v1799_v44 }
 0xe05   :  { %v1796_v46 = vsel %vm33_vm0, %v1794_v45, 0.0 }
 0xe06   :  { %1797 = vadd.xlane.f32.xlu1 %v1796_v46 }
 0xe8d   :  { %v1801_v47 = vpop.xlane.xlu0 %1800 }
 0xe8e   :  { %v1803_v48 = vmul.f32 0.03125, %v1801_v47 }
 0xe8f   :  { %v1798_v49 = vpop.xlane.xlu1 %1797 }
 0xe90   :  { %v1805_v50 = vsub.f32 %v1795_v43, %v1803_v48  ;;  %v1802_v51 = vmul.f32 0.03125, %v1798_v49 }
 0xe92   :  { %v1804_v52 = vsub.f32 %v1794_v45, %v1802_v51  ;;  %v1807_v53 = vmul.f32 %v1805_v50, %v1805_v50 }
 0xe94   :  { %v1811_v54 = vsel %vm33_vm0, %v1807_v53, 0.0  ;;  %v1806_v55 = vmul.f32 %v1804_v52, %v1804_v52 }
 0xe95   :  { %1812 = vadd.xlane.f32.xlu0 %v1811_v54 }
 0xe96   :  { %v1808_v56 = vsel %vm33_vm0, %v1806_v55, 0.0 }
 0xe97   :  { %1809 = vadd.xlane.f32.xlu1 %v1808_v56 }
 0xf1e   :  { %v1813_v57 = vpop.xlane.xlu0 %1812 }
 0xf1f   :  { %v1815_v58 = vmul.f32 0.03125, %v1813_v57 }
 0xf20   :  { %v1810_v59 = vpop.xlane.xlu1 %1809 }
 0xf21   :  { %v1817_v5 = vadd.f32 1e-05, %v1815_v58  ;;  %v1814_v2 = vmul.f32 0.03125, %v1810_v59 }
 0xf23   :  { %2131 = vrsqrt.f32 %v1817_v5  ;;  %v1816_v60 = vadd.f32 1e-05, %v1814_v2 }
 0xf25   :  { %2133 = vrsqrt.f32 %v1816_v60 }
 0xf30   :  { %v2132_v7 = vpop.eup %2131 }
 0xf31   :  { %v1821_v9 = vmul.f32 %v2132_v7, %v1805_v50 }
 0xf32   :  { %v2134_v6 = vpop.eup %2133 }
 0xf33   :  { %v1820_v12 = vmul.f32 %v2134_v6, %v1804_v52  ;;  %v1827_v13 = vmul.f32 %v1825_v63, %v1821_v9 }
 0xf35   :  { %v1826_v16 = vmul.f32 %v1825_v63, %v1820_v12  ;;  %v1833_v17 = vadd.f32 %v1831_v11, %v1827_v13 }
 0xf37   :  { %v1832_v18 = vadd.f32 %v1831_v11, %v1826_v16  ;;  %1835 = vst.msk [vmem:[#allocation3 + $0x8] sm:$0xff] %vm33_vm0, %v1833_v17 }
 0xf39   :  { %1834 = vst.msk [vmem:[#allocation3] sm:$0xff] %vm33_vm0, %v1832_v18 }
 0xf3a   :  { %2146 = shalt.err (!%p2143_p4)
}
 0xf3b   :  { %s2175_s14 = smov 128  }
 0xf3c   :  { %1847 = dma.vmem_to_hbm [thread:$0]  %s1842_s11, 256, %s2460_s4, [#allocation4], %s2175_s14, %s2175_s14, %s2170_s12  }
 0xf3d   :  { %2155 = dma.done.wait [#allocation4], 256  }
 0xf3e   :  { %2156 = vsyncadd [#allocation4], 4294967040 }
 0xf3f   :  { %1851 = vsyncpa [#allocation4], 1 }

</bundles_post_ra>
